<compile_context>
chip_gen: v7x
topology: tpu7x:2x2x1
jax: 0.10.0
libtpu: 0.0.40
codegen_flags: <defaults>
</compile_context>

<pallas_src>
import jax
import jax.numpy as jnp
from jax.experimental import pallas as pl
from jax.experimental.pallas import tpu as pltpu

LANE_WIDTH = 512          # lane-dense last dim (multiple of 128)
TILE_ROWS = 512           # 512 * 512 * 4 B = 1 MiB per f32 buffer
SMALL_N_FAST_PATH = 65536  # below this, plain XLA sigmoid beats a kernel launch


def logreg_kernel(x_ref, w_ref, b_ref, o_ref):
    # w, b are f32 scalars in SMEM; x/o are lane-dense VMEM tiles.
    w = w_ref[0, 0]
    b = b_ref[0, 0]
    z = x_ref[...].astype(jnp.float32) * w + b        # VPU FMA, f32
    sig = 0.5 * jnp.tanh(0.5 * z) + 0.5               # exact sigmoid, 1 EUP op
    o_ref[...] = sig.astype(o_ref.dtype)


def logistic_regression(x, weight, bias, *, tile_rows=TILE_ROWS, lane=LANE_WIDTH,
                        force_kernel=False):
    """y = sigmoid(x @ W^T + b) for x:(N,1), W:(1,1), b:(1,) -- PyTorch layout."""
    N, f_in = x.shape
    assert f_in == 1, "LogisticRegressionModel uses Linear(1, 1)"

    w_scalar = weight.reshape(()).astype(jnp.float32)
    b_scalar = bias.reshape(()).astype(jnp.float32)

    # Tiny-batch fast path: pad/launch/slice would dominate by orders of magnitude.
    if (not force_kernel) and N < SMALL_N_FAST_PATH:
        z = x.astype(jnp.float32) * w_scalar + b_scalar
        return jax.nn.sigmoid(z).astype(x.dtype)

    # Flatten; pad only up to the lane width (Pallas masks the ragged last
    # row-block, so no full-tile padding is needed).
    n_pad = pl.cdiv(N, lane) * lane
    x_flat = x.reshape(-1)
    padded = n_pad != N
    if padded:
        x_flat = jnp.pad(x_flat, (0, n_pad - N))
    rows = n_pad // lane
    x2d = x_flat.reshape(rows, lane)

    # If the whole batch fits in one tile, shrink the block to the exact array
    # extent (block dims must be (8,128)-divisible OR equal the full dim).
    tile_rows_eff = min(tile_rows, rows)
    grid_len = pl.cdiv(rows, tile_rows_eff)

    w2d = w_scalar.reshape(1, 1)
    b2d = b_scalar.reshape(1, 1)

    out2d = pl.pallas_call(
        logreg_kernel,
        out_shape=jax.ShapeDtypeStruct((rows, lane), x.dtype),
        grid_spec=pltpu.PrefetchScalarGridSpec(
            num_scalar_prefetch=0,
            grid=(grid_len,),
            in_specs=[
                pl.BlockSpec((tile_rows_eff, lane), lambda i: (i, 0)),   # x slab
                pl.BlockSpec(memory_space=pltpu.MemorySpace.SMEM),       # weight
                pl.BlockSpec(memory_space=pltpu.MemorySpace.SMEM),       # bias
            ],
            out_specs=pl.BlockSpec((tile_rows_eff, lane), lambda i: (i, 0)),
        ),
        compiler_params=pltpu.CompilerParams(
            dimension_semantics=("parallel",),        # lets v7x shard across 2 TCs
            allow_input_fusion=[True, False, False],  # fuse pad/reshape into input
        ),
    )(x2d, w2d, b2d)

    # Restore the PyTorch (N, 1) output layout (free reshape when no padding).
    if padded:
        return out2d.reshape(-1)[:N].reshape(N, 1)
    return out2d.reshape(N, 1)


if __name__ == "__main__":
    key = jax.random.PRNGKey(0)
    kx, kw, kb, kx2 = jax.random.split(key, 4)

    # Deterministic parameter init (mimics nn.Linear uniform init for in_features=1).
    weight = jax.random.uniform(kw, (1, 1), minval=-1.0, maxval=1.0, dtype=jnp.float32)
    bias = jax.random.uniform(kb, (1,), minval=-1.0, maxval=1.0, dtype=jnp.float32)

    # Small batch of scalar inputs, consistent with Linear(1, 1).
    # force_kernel=True so the Pallas path (not the small-N fast path) runs.
    N = 8
    x = jax.random.normal(kx, (N, 1), dtype=jnp.float32)
    y = logistic_regression(x, weight, bias, force_kernel=True)
    jax.block_until_ready(y)
    y_ref = jax.nn.sigmoid(x @ weight.T + bias)
    assert y.shape == y_ref.shape, (y.shape, y_ref.shape)
    assert jnp.allclose(y, y_ref, atol=1e-5, rtol=1e-5), (y, y_ref)

    # Larger check: multiple grid steps + ragged last block + padding path.
    N2 = 300001
    x2 = jax.random.normal(kx2, (N2, 1), dtype=jnp.float32)
    y2 = logistic_regression(x2, weight, bias)
    jax.block_until_ready(y2)
    y2_ref = jax.nn.sigmoid(x2 @ weight.T + bias)
    assert y2.shape == y2_ref.shape, (y2.shape, y2_ref.shape)
    assert jnp.allclose(y2, y2_ref, atol=1e-5, rtol=1e-5)

    print("KERNEL_OK")
</pallas_src>

<mosaic_0001>
module attributes {stable_mosaic.version = 11 : i64} {
  func.func @logreg_kernel(%arg0: i32, %arg1: memref<1x512xf32, #tpu.memory_space<vmem>>, %arg2: memref<1x1xf32, #tpu.memory_space<smem>>, %arg3: memref<1x1xf32, #tpu.memory_space<smem>>, %arg4: memref<1x512xf32, #tpu.memory_space<vmem>>) attributes {dimension_semantics = [#tpu.dimension_semantics<parallel>], iteration_bounds = array<i64: 1>, scalar_prefetch = 0 : i64, scratch_operands = 0 : i64, tpu.core_type = #tpu.core_type<tc>, window_params = [{transform_indices = @transform_0, window_bounds = array<i64: 1, 512>}, {transform_indices = @transform_1, window_bounds = array<i64: 1, 1>}, {transform_indices = @transform_2, window_bounds = array<i64: 1, 1>}, {transform_indices = @transform_3, window_bounds = array<i64: 1, 512>}]} {
    %c0 = arith.constant 0 : index
    %c0_0 = arith.constant 0 : index
    %0 = memref.load %arg2[%c0, %c0_0] : memref<1x1xf32, #tpu.memory_space<smem>>
    %c0_1 = arith.constant 0 : index
    %c0_2 = arith.constant 0 : index
    %1 = memref.load %arg3[%c0_1, %c0_2] : memref<1x1xf32, #tpu.memory_space<smem>>
    %c0_3 = arith.constant 0 : index
    %c0_4 = arith.constant 0 : index
    %2 = vector.load %arg1[%c0_3, %c0_4] : memref<1x512xf32, #tpu.memory_space<vmem>>, vector<1x512xf32>
    %3 = vector.broadcast %0 : f32 to vector<1x512xf32>
    %4 = arith.mulf %2, %3 : vector<1x512xf32>
    %5 = vector.broadcast %1 : f32 to vector<1x512xf32>
    %6 = arith.addf %4, %5 : vector<1x512xf32>
    %cst = arith.constant 5.000000e-01 : f32
    %7 = vector.broadcast %cst : f32 to vector<1x512xf32>
    %8 = arith.mulf %7, %6 : vector<1x512xf32>
    %9 = math.tanh %8 : vector<1x512xf32>
    %cst_5 = arith.constant 5.000000e-01 : f32
    %10 = vector.broadcast %cst_5 : f32 to vector<1x512xf32>
    %11 = arith.mulf %10, %9 : vector<1x512xf32>
    %cst_6 = arith.constant 5.000000e-01 : f32
    %12 = vector.broadcast %cst_6 : f32 to vector<1x512xf32>
    %13 = arith.addf %11, %12 : vector<1x512xf32>
    %c0_7 = arith.constant 0 : index
    %c0_8 = arith.constant 0 : index
    %14 = vector.load %arg4[%c0_7, %c0_8] : memref<1x512xf32, #tpu.memory_space<vmem>>, vector<1x512xf32>
    tpu.vector_store %arg4[%c0_7, %c0_8], %13 {strides = array<i32>} : memref<1x512xf32, #tpu.memory_space<vmem>>, vector<1x512xf32>,
    return
  }
  func.func @transform_0(%arg0: i32) -> (i32, i32) {
    %c0_i32 = arith.constant 0 : i32
    %c0_i32_0 = arith.constant 0 : i32
    return %arg0, %c0_i32 : i32, i32
  }
  func.func @transform_1(%arg0: i32) -> (i32, i32) {
    %c0_i32 = arith.constant 0 : i32
    %c0_i32_0 = arith.constant 0 : i32
    %c0_i32_1 = arith.constant 0 : i32
    return %c0_i32, %c0_i32_0 : i32, i32
  }
  func.func @transform_2(%arg0: i32) -> (i32, i32) {
    %c0_i32 = arith.constant 0 : i32
    %c0_i32_0 = arith.constant 0 : i32
    %c0_i32_1 = arith.constant 0 : i32
    return %c0_i32, %c0_i32_0 : i32, i32
  }
  func.func @transform_3(%arg0: i32) -> (i32, i32) {
    %c0_i32 = arith.constant 0 : i32
    %c0_i32_0 = arith.constant 0 : i32
    return %arg0, %c0_i32 : i32, i32
  }
}

</mosaic_0001>

<bundles_post_ra>
// kernel: tpu_custom_call.1
= control target key start
LH: loop header
LB: loop body
LE: loop exit
PB: predicated region body
PF: predicated region fallthrough
CT: control target
= control target key end

     0   :  { %s116_s0 = inlined_call_operand.vmem [shape: f32[1,512], index: 0, kind: input, shape index: {}]   ;;  %s117_s1 = inlined_call_operand.<no memory space> [shape: f32[1,1], index: 1, kind: input, shape index: {}]   ;;  %s118_s2 = inlined_call_operand.<no memory space> [shape: f32[1,1], index: 2, kind: input, shape index: {}]   ;;  %s119_s3 = inlined_call_operand.hbm [shape: f32[1,512], index: 3, kind: output, shape index: {}]  }
   0x1   :  { %v19_v0 = vld [vmem:[%s116_s0] sm:$0xf]  ;;  %v20_v1 = vstv %s117_s1  ;;  %v22_v2 = vstv %s118_s2 }
   0x2   :  { %10 = vsyncpa [#allocation5], 0  ;;  %v21_v3 = vmul.f32 %v20_v1, %v19_v0  ;;  %v28_v6 = vlaneseq  ;;  %s74_s18 = smov [#allocation4]  }
   0x3   :  { %s39_s19 = sshll.u32 %s74_s18, 4  ;;  %s40_s19 = int_to_ptr.vmem [resolvable:$true] %s39_s19 }
   0x4   :  { %v23_v4 = vadd.f32 %v22_v2, %v21_v3  ;;  %vm30_vm0 = vcmp.lt.s32.totalorder %v28_v6, 512  ;;  %s50_s0 = scalar_lea.vmem %s40_s19, 64  ;;  %p55_p1 = scmp.lt.s32.totalorder %s40_s19, %s40_s19 }
   0x5   :  { %p51_p0 = scmp.ne.s32.totalorder %s40_s19, %s50_s0  ;;  %p56_p2 = scmp.lt.s32.totalorder %s50_s0, %s50_s0 }
   0x6   :  { %v24_v5 = vmul.f32 0.5, %v23_v4 }
   0x7   :  { %p57_p3 = por %p56_p2, %p55_p1 }
   0x8   :  { %48 = vtanh.f32 %v24_v5 }
   0x9   :  { %p58_p4 = pnand %p57_p3, %p51_p0 }
  0x12   :  { %v49_v7 = vpop.eup %48 }
  0x13   :  { %v26_v8 = vmul.f32 0.5, %v49_v7 }
  0x15   :  { %v27_v9 = vadd.f32 0.5, %v26_v8 }
  0x17   :  { %32 = vst.msk [vmem:[#allocation4] sm:$0xf] %vm30_vm0, %v27_v9 }
  0x18   :  { %61 = shalt.err (!%p58_p4)
}
  0x19   :  { %s62_s20 = scalar_lea.hbm %s119_s3, 64 }
  0x1a   :  { %p63_p5 = scmp.ne.s32.totalorder %s119_s3, %s62_s20  ;;  %p66_p6 = scmp.lt.u32.totalorder %s62_s20, %s119_s3 }
  0x1c   :  { %p68_p7 = pnand %p66_p6, %p63_p5 }
  0x1e   :  { %71 = shalt.err (!%p68_p7)
}
  0x1f   :  { %42 = dma.vmem_to_hbm [thread:$0]  %s40_s19, 64, %s119_s3, [#allocation5]  }
  0x20   :  { %72 = dma.done.wait [#allocation5], 64  }
  0x21   :  { %73 = vsyncadd [#allocation5], 4294967232 }
  0x22   :  { %46 = vsyncpa [#allocation5], 1 }

</bundles_post_ra>
